<compile_context>
chip_gen: v7x
topology: tpu7x:2x2x1
jax: 0.10.0
libtpu: 0.0.40
codegen_flags: <defaults>
</compile_context>

<pallas_src>
import functools

import jax
import jax.numpy as jnp
from jax.experimental import pallas as pl
from jax.experimental.pallas import tpu as pltpu


def _focal_loss_kernel(pred_ref, tgt_ref, out_ref, *, alpha, gamma):
    # pred_ref : (Tr, Cp) logits (any float dtype; upcast to f32 in-kernel)
    # tgt_ref  : (Tr, 1)  int32 class indices
    # out_ref  : (Tr, Cp) f32 per-element focal loss
    x = pred_ref[...].astype(jnp.float32)
    tgt = tgt_ref[...]                                        # (Tr, 1) i32

    # one-hot via iota-compare along the (lane-mapped) class axis
    cls = jax.lax.broadcasted_iota(jnp.int32, x.shape, 1)
    one_hot = (cls == tgt).astype(jnp.float32)                # (Tr, Cp)

    # Shared transcendental: one exp feeds both stable-BCE and sigmoid.
    e = jnp.exp(-jnp.abs(x))                                  # EUP exp
    # BCE-with-logits, reduction='none', target = one_hot
    bce = jnp.maximum(x, 0.0) - x * one_hot + jnp.log1p(e)    # EUP log1p
    inv = 1.0 / (1.0 + e)                                     # one divide
    sig = jnp.where(x >= 0.0, inv, e * inv)                   # sigmoid(x)

    # 1 - p_t == one_hot*(1-sig) + (1-one_hot)*sig
    one_minus_pt = one_hot + sig - 2.0 * one_hot * sig

    if gamma == 2.0:                                          # default fast path
        mod = one_minus_pt * one_minus_pt
    elif gamma == 0.0:
        mod = jnp.ones_like(one_minus_pt)
    elif float(gamma).is_integer() and 0.0 < gamma <= 4.0:
        mod = one_minus_pt
        for _ in range(int(gamma) - 1):
            mod = mod * one_minus_pt
    else:
        # guard log(0) when 1 - p_t underflows for very confident predictions
        mod = jnp.exp(gamma * jnp.log(jnp.maximum(one_minus_pt, 1e-30)))

    loss = bce * mod
    if alpha > 0:
        # one_hot*alpha + (1-one_hot)*(1-alpha), simplified to one mul + one add
        loss = loss * ((1.0 - alpha) + one_hot * (2.0 * alpha - 1.0))
    out_ref[...] = loss


def focal_loss(pred, targets, gamma=2.0, alpha=0.75, block_rows=512):
    bs, nc = pred.shape

    # Lane-dense class axis: pad to a multiple of 128 so stores are unmasked.
    nc_pad = pl.cdiv(nc, 128) * 128
    # Row tile: multiple of 8 sublanes; capped so tiny inputs aren't over-padded.
    tr = max(8, min(block_rows, pl.cdiv(bs, 8) * 8))
    rows_pad = pl.cdiv(bs, tr) * tr

    pred_p = jnp.pad(pred, ((0, rows_pad - bs), (0, nc_pad - nc)))
    tgt_p = jnp.pad(targets.astype(jnp.int32), ((0, rows_pad - bs),))
    tgt_p = tgt_p.reshape(rows_pad, 1)

    kernel = functools.partial(
        _focal_loss_kernel, alpha=float(alpha), gamma=float(gamma))

    out = pl.pallas_call(
        kernel,
        out_shape=jax.ShapeDtypeStruct((rows_pad, nc_pad), jnp.float32),
        grid=(rows_pad // tr,),
        in_specs=[
            pl.BlockSpec((tr, nc_pad), lambda i: (i, 0)),
            pl.BlockSpec((tr, 1), lambda i: (i, 0)),
        ],
        out_specs=pl.BlockSpec((tr, nc_pad), lambda i: (i, 0)),
        compiler_params=pltpu.CompilerParams(
            dimension_semantics=("parallel",),
            vmem_limit_bytes=32 * 1024 * 1024,
        ),
    )(pred_p, tgt_p)

    return out[:bs, :nc]


def _reference(pred, targets, gamma=2.0, alpha=0.75):
    # Pure-JAX mirror of the PyTorch FocalLoss.forward
    bs, nc = pred.shape
    one_hot = jax.nn.one_hot(targets, nc, dtype=jnp.float32)
    x = pred.astype(jnp.float32)
    bce = jnp.maximum(x, 0.0) - x * one_hot + jnp.log1p(jnp.exp(-jnp.abs(x)))
    p = jax.nn.sigmoid(x)
    p_t = one_hot * p + (1.0 - one_hot) * (1.0 - p)
    loss = bce * (1.0 - p_t) ** gamma
    if alpha > 0:
        loss = loss * (one_hot * alpha + (1.0 - one_hot) * (1.0 - alpha))
    return loss


if __name__ == "__main__":
    key = jax.random.PRNGKey(0)
    k1, k2 = jax.random.split(key, 2)

    bs, nc = 8, 32
    pred = jax.random.normal(k1, (bs, nc), dtype=jnp.float32) * 2.0
    targets = jax.random.randint(k2, (bs,), 0, nc, dtype=jnp.int32)

    out = focal_loss(pred, targets)
    out = jax.block_until_ready(out)

    ref = _reference(pred, targets)
    assert out.shape == (bs, nc)
    assert jnp.allclose(out, ref, atol=1e-5, rtol=1e-5), "mismatch vs reference"

    print("KERNEL_OK")
</pallas_src>

<mosaic_0001>
module attributes {stable_mosaic.version = 11 : i64} {
  func.func @_focal_loss_kernel(%arg0: i32, %arg1: memref<8x128xf32, #tpu.memory_space<vmem>>, %arg2: memref<8x1xi32, #tpu.memory_space<vmem>>, %arg3: memref<8x128xf32, #tpu.memory_space<vmem>>) attributes {dimension_semantics = [#tpu.dimension_semantics<parallel>], iteration_bounds = array<i64: 1>, scalar_prefetch = 0 : i64, scratch_operands = 0 : i64, tpu.core_type = #tpu.core_type<tc>, window_params = [{transform_indices = @transform_0, window_bounds = array<i64: 8, 128>}, {transform_indices = @transform_1, window_bounds = array<i64: 8, 1>}, {transform_indices = @transform_2, window_bounds = array<i64: 8, 128>}]} {
    %c0 = arith.constant 0 : index
    %c0_0 = arith.constant 0 : index
    %0 = vector.load %arg1[%c0, %c0_0] : memref<8x128xf32, #tpu.memory_space<vmem>>, vector<8x128xf32>
    %c0_1 = arith.constant 0 : index
    %c0_2 = arith.constant 0 : index
    %1 = vector.load %arg2[%c0_1, %c0_2] : memref<8x1xi32, #tpu.memory_space<vmem>>, vector<8x1xi32>
    %2 = tpu.iota {dimensions = array<i32: 1>} : vector<8x128xi32>
    %3 = vector.broadcast %1 : vector<8x1xi32> to vector<8x128xi32>
    %4 = arith.cmpi eq, %2, %3 : vector<8x128xi32>
    %5 = arith.extui %4 : vector<8x128xi1> to vector<8x128xi32>
    %6 = arith.sitofp %5 : vector<8x128xi32> to vector<8x128xf32>
    %7 = math.absf %0 : vector<8x128xf32>
    %cst = arith.constant 0.000000e+00 : f32
    %8 = vector.broadcast %cst : f32 to vector<8x128xf32>
    %9 = arith.subf %8, %7 : vector<8x128xf32>
    %10 = math.exp %9 : vector<8x128xf32>
    %cst_3 = arith.constant 0.000000e+00 : f32
    %11 = vector.broadcast %cst_3 : f32 to vector<8x128xf32>
    %12 = arith.maximumf %0, %11 : vector<8x128xf32>
    %13 = arith.mulf %0, %6 : vector<8x128xf32>
    %14 = arith.subf %12, %13 : vector<8x128xf32>
    %15 = math.log1p %10 : vector<8x128xf32>
    %16 = arith.addf %14, %15 : vector<8x128xf32>
    %cst_4 = arith.constant 1.000000e+00 : f32
    %17 = vector.broadcast %cst_4 : f32 to vector<8x128xf32>
    %18 = arith.addf %17, %10 : vector<8x128xf32>
    %cst_5 = arith.constant 1.000000e+00 : f32
    %19 = vector.broadcast %cst_5 : f32 to vector<8x128xf32>
    %20 = arith.divf %19, %18 : vector<8x128xf32>
    %cst_6 = arith.constant 0.000000e+00 : f32
    %21 = vector.broadcast %cst_6 : f32 to vector<8x128xf32>
    %22 = arith.cmpf oge, %0, %21 : vector<8x128xf32>
    %23 = arith.mulf %10, %20 : vector<8x128xf32>
    %24 = arith.select %22, %20, %23 : vector<8x128xi1>, vector<8x128xf32>
    %25 = arith.addf %6, %24 : vector<8x128xf32>
    %cst_7 = arith.constant 2.000000e+00 : f32
    %26 = vector.broadcast %cst_7 : f32 to vector<8x128xf32>
    %27 = arith.mulf %26, %6 : vector<8x128xf32>
    %28 = arith.mulf %27, %24 : vector<8x128xf32>
    %29 = arith.subf %25, %28 : vector<8x128xf32>
    %30 = arith.mulf %29, %29 : vector<8x128xf32>
    %31 = arith.mulf %16, %30 : vector<8x128xf32>
    %cst_8 = arith.constant 5.000000e-01 : f32
    %32 = vector.broadcast %cst_8 : f32 to vector<8x128xf32>
    %33 = arith.mulf %6, %32 : vector<8x128xf32>
    %cst_9 = arith.constant 2.500000e-01 : f32
    %34 = vector.broadcast %cst_9 : f32 to vector<8x128xf32>
    %35 = arith.addf %34, %33 : vector<8x128xf32>
    %36 = arith.mulf %31, %35 : vector<8x128xf32>
    %c0_10 = arith.constant 0 : index
    %c0_11 = arith.constant 0 : index
    %37 = vector.load %arg3[%c0_10, %c0_11] : memref<8x128xf32, #tpu.memory_space<vmem>>, vector<8x128xf32>
    tpu.vector_store %arg3[%c0_10, %c0_11], %36 {strides = array<i32>} : memref<8x128xf32, #tpu.memory_space<vmem>>, vector<8x128xf32>,
    return
  }
  func.func @transform_0(%arg0: i32) -> (i32, i32) {
    %c0_i32 = arith.constant 0 : i32
    %c0_i32_0 = arith.constant 0 : i32
    return %arg0, %c0_i32 : i32, i32
  }
  func.func @transform_1(%arg0: i32) -> (i32, i32) {
    %c0_i32 = arith.constant 0 : i32
    %c0_i32_0 = arith.constant 0 : i32
    return %arg0, %c0_i32 : i32, i32
  }
  func.func @transform_2(%arg0: i32) -> (i32, i32) {
    %c0_i32 = arith.constant 0 : i32
    %c0_i32_0 = arith.constant 0 : i32
    return %arg0, %c0_i32 : i32, i32
  }
}

</mosaic_0001>

<bundles_post_ra>
// kernel: tpu_custom_call.1
= control target key start
LH: loop header
LB: loop body
LE: loop exit
PB: predicated region body
PF: predicated region fallthrough
CT: control target
= control target key end

     0   :  { %s140_s0 = inlined_call_operand.vmem [shape: f32[8,128], index: 0, kind: input, shape index: {}]   ;;  %s141_s1 = inlined_call_operand.vmem [shape: s32[8,1], index: 1, kind: input, shape index: {}]   ;;  %s142_s2 = inlined_call_operand.hbm [shape: f32[8,128], index: 2, kind: output, shape index: {}]  }
   0x1   :  { %v13_v0 = vld [vmem:[%s141_s1] sm:$0xff] }
   0x2   :  { %7 = vsyncpa [#allocation3], 0  ;;  %v104_v1 = vmov 0   ;;  %v12_v2 = vld [vmem:[%s140_s0] sm:$0xff]  ;;  %v14_v8 = vlaneseq  ;;  %v105_v18 = vmov 0.0   ;;  %s106_s0 = smov [#allocation2]  }
   0x3   :  { %73 = vset.pattern.permute.xlu0 %v104_v1  ;;  %v22_v3 = vand.u32 2147483647, %v12_v2  ;;  %vm42_vm0 = vcmp.ge.f32.partialorder %v12_v2, 0.0  ;;  %v26_v17 = vmax.f32 %v12_v2, 0.0  ;;  %s61_s1 = sshll.u32 %s106_s0, 4  ;;  %s62_s1 = int_to_ptr.vmem [resolvable:$true] %s61_s1 }
   0x4   :  { %17 = vperm.xlu0 %73, %v13_v0   ;;  %v15_v11 = vand.u32 127, %v14_v8  ;;  %s80_s13 = scalar_lea.vmem %s62_s1, 128  ;;  %p85_p1 = scmp.lt.s32.totalorder %s62_s1, %s62_s1 }
   0x5   :  { %v23_v4 = vsub.f32 0.0, %v22_v3  ;;  %p81_p0 = scmp.ne.s32.totalorder %s62_s1, %s80_s13  ;;  %p86_p2 = scmp.lt.s32.totalorder %s80_s13, %s80_s13 }
   0x7   :  { %v24_v5 = vmul.f32 1.442695, %v23_v4  ;;  %p87_p3 = por %p86_p2, %p85_p1 }
   0x9   :  { %74 = vpow2.f32 %v24_v5  ;;  %p88_p4 = pnand %p87_p3, %p81_p0 }
  0x13   :  { %v75_v6 = vpop.eup %74 }
  0x14   :  { %v29_v7 = vadd.f32 1.0, %v75_v6  ;;  %v32_v9 = vmul.f32 -0.5, %v75_v6  ;;  %v35_v15 = vand.u32 2147483647, %v75_v6 }
  0x16   :  { %76 = vrcp.f32 %v29_v7  ;;  %v33_v13 = vadd.f32 1.0, %v32_v9  ;;  %vm36_vm2 = vcmp.lt.f32.partialorder %v35_v15, 0.0004427343 }
  0x17   :  { %78 = vlog2.f32 %v29_v7 }
  0x18   :  { %v34_v22 = vmul.f32 %v75_v6, %v33_v13 }
  0x20   :  { %v77_v10 = vpop.eup %76 }
  0x21   :  { %v43_v12 = vmul.f32 %v77_v10, %v75_v6  ;;  %v79_v14 = vpop.eup %78 }
  0x22   :  { %v31_v21 = vmul.f32 0.6931472, %v79_v14 }
  0x23   :  { %v44_v20 = vsel %vm42_vm0, %v77_v10, %v43_v12 }
  0x24   :  { %v37_v28 = vsel %vm36_vm2, %v34_v22, %v31_v21 }
  0x83   :  { %v18_v16 = vpop.permute.xlu0 %17 }
  0x84   :  { %vm19_vm1 = vcmp.eq.s32.totalorder %v15_v11, %v18_v16 }
  0x85   :  { %v69_v19 = vsel %vm19_vm1, 1.0, %v105_v18 }
  0x86   :  { %v27_v23 = vmul.f32 %v69_v19, %v12_v2  ;;  %v46_v24 = vmul.f32 2.0, %v69_v19  ;;  %v45_v26 = vadd.f32 %v69_v19, %v44_v20  ;;  %v51_v30 = vmul.f32 0.5, %v69_v19 }
  0x88   :  { %v28_v25 = vsub.f32 %v26_v17, %v27_v23  ;;  %v47_v27 = vmul.f32 %v46_v24, %v44_v20  ;;  %v52_v34 = vadd.f32 0.25, %v51_v30 }
  0x8a   :  { %v48_v29 = vsub.f32 %v45_v26, %v47_v27  ;;  %v38_v31 = vadd.f32 %v37_v28, %v28_v25 }
  0x8c   :  { %v49_v32 = vmul.f32 %v48_v29, %v48_v29 }
  0x8e   :  { %v50_v33 = vmul.f32 %v49_v32, %v38_v31 }
  0x90   :  { %v53_v35 = vmul.f32 %v52_v34, %v50_v33 }
  0x92   :  { %54 = vst [vmem:[#allocation2] sm:$0xff] %v53_v35 }
  0x93   :  { %91 = shalt.err (!%p88_p4)
}
  0x94   :  { %s92_s16 = scalar_lea.hbm %s142_s2, 128 }
  0x95   :  { %p93_p5 = scmp.ne.s32.totalorder %s142_s2, %s92_s16  ;;  %p96_p6 = scmp.lt.u32.totalorder %s92_s16, %s142_s2 }
  0x97   :  { %p98_p7 = pnand %p96_p6, %p93_p5 }
  0x99   :  { %101 = shalt.err (!%p98_p7)
}
  0x9a   :  { %64 = dma.vmem_to_hbm [thread:$0]  %s62_s1, 128, %s142_s2, [#allocation3]  }
  0x9b   :  { %102 = dma.done.wait [#allocation3], 128  }
  0x9c   :  { %103 = vsyncadd [#allocation3], 4294967168 }
  0x9d   :  { %68 = vsyncpa [#allocation3], 1 }

</bundles_post_ra>
